<compile_context>
chip_gen: v6e
topology: v6e:2x2x1
jax: 0.10.0
libtpu: 0.0.40
codegen_flags: <defaults>
</compile_context>

<pallas_src>
import jax
import jax.numpy as jnp
from jax.experimental import pallas as pl
from jax.experimental.pallas import tpu as pltpu

_EPS = 1e-5
_LANE = 128


def _round_up(v, m):
    return (v + m - 1) // m * m


# ----------------------------- Fused Pallas kernel -----------------------------

def _make_fused_mlp_kernel(num_blocks):
    """Kernel refs layout:
         x_ref, w_0, ..., w_{num_blocks}, slab_ref, o_ref
       slab rows (f32, width = max padded out dim):
         [gamma_0, beta_0, gamma_1, beta_1, ..., final_linear_bias]
    """
    num_layers = num_blocks + 1

    def kernel(*refs):
        x_ref = refs[0]
        w_refs = refs[1:1 + num_layers]
        slab_ref = refs[1 + num_layers]
        o_ref = refs[-1]

        n = x_ref.shape[0]
        inv_n = jnp.float32(1.0 / n)

        h = x_ref[...].astype(jnp.bfloat16)            # f32 -> bf16 cast on the VPU

        for i in range(num_blocks):
            w_ref = w_refs[i]
            out_pad = w_ref.shape[1]
            # Linear (bias omitted: exactly cancelled by the BN mean subtraction).
            y = jnp.dot(h, w_ref[...], preferred_element_type=jnp.float32)
            # BatchNorm1d, training mode: batch mean + biased variance, f32.
            mean = jnp.sum(y, axis=0, keepdims=True) * inv_n
            d = y - mean
            var = jnp.sum(d * d, axis=0, keepdims=True) * inv_n
            gamma = slab_ref[2 * i:2 * i + 1, 0:out_pad]
            beta = slab_ref[2 * i + 1:2 * i + 2, 0:out_pad]
            y = d * jax.lax.rsqrt(var + _EPS) * gamma + beta
            # ReLU, back to bf16 for the next MXU pass.
            h = jnp.maximum(y, 0.0).astype(jnp.bfloat16)

        # Final Linear (bias kept).
        w_ref = w_refs[num_blocks]
        out_pad = w_ref.shape[1]
        b_last = slab_ref[2 * num_blocks:2 * num_blocks + 1, 0:out_pad]
        o_ref[...] = jnp.dot(h, w_ref[...],
                             preferred_element_type=jnp.float32) + b_last

    return kernel


# ----------------------------- Parameters -----------------------------

def init_mlp_params(key, layer_sizes, input_shape):
    """PyTorch-layout parameters (w: (out, in), b: (out,)), f32."""
    input_size = input_shape[0] * input_shape[1] * input_shape[2]
    params = []
    in_f = input_size
    for i in range(len(layer_sizes) - 1):
        out_f = layer_sizes[i]
        key, kw, kb = jax.random.split(key, 3)
        bound = 1.0 / jnp.sqrt(jnp.float32(in_f))
        w = jax.random.uniform(kw, (out_f, in_f), jnp.float32, -bound, bound)
        b = jax.random.uniform(kb, (out_f,), jnp.float32, -bound, bound)
        gamma = jnp.ones((out_f,), jnp.float32)
        beta = jnp.zeros((out_f,), jnp.float32)
        params.append(("block", w, b, gamma, beta))
        in_f = out_f
    out_f = layer_sizes[-1]
    key, kw, kb = jax.random.split(key, 3)
    bound = 1.0 / jnp.sqrt(jnp.float32(in_f))
    w = jax.random.uniform(kw, (out_f, in_f), jnp.float32, -bound, bound)
    b = jax.random.uniform(kb, (out_f,), jnp.float32, -bound, bound)
    params.append(("linear", w, b))
    return params


def prepare_params(params, input_size):
    """One-time prep: transpose weights to (in, out), zero-pad out-features to a
    multiple of 128 (lane-dense), cast matmul operands to bf16, pack all
    per-feature vectors (gamma/beta per block + final bias) into one f32 slab.
    Block Linear biases are dropped (cancelled by training-mode BatchNorm)."""
    weights = []          # bf16 (in_used_pad, out_pad)
    gb_rows = []          # (pad_fill, 1-D vector) per slab row
    layer_dims = []       # (in_dim, out_pad) for the cost estimate
    cur_in, cur_in_pad = input_size, input_size   # kernel input h has exactly K cols
    num_blocks = 0
    out_f = out_pad = None
    final_bias = None
    for p in params:
        if p[0] == "block":
            _, w, _b, gamma, beta = p            # block bias intentionally unused
            out_f = w.shape[0]
            out_pad = _round_up(out_f, _LANE)
            wt = jnp.zeros((cur_in_pad, out_pad), jnp.float32)
            wt = wt.at[:cur_in, :out_f].set(w.T)
            weights.append(wt.astype(jnp.bfloat16))
            gb_rows.append((1.0, jnp.pad(gamma, (0, out_pad - out_f),
                                         constant_values=1.0)))
            gb_rows.append((0.0, jnp.pad(beta, (0, out_pad - out_f))))
            layer_dims.append((cur_in_pad, out_pad))
            cur_in, cur_in_pad = out_f, out_pad
            num_blocks += 1
        else:
            _, w, b = p
            out_f = w.shape[0]
            out_pad = _round_up(out_f, _LANE)
            wt = jnp.zeros((cur_in_pad, out_pad), jnp.float32)
            wt = wt.at[:cur_in, :out_f].set(w.T)
            weights.append(wt.astype(jnp.bfloat16))
            final_bias = jnp.pad(b, (0, out_pad - out_f))
            layer_dims.append((cur_in_pad, out_pad))

    all_rows = gb_rows + [(0.0, final_bias)]
    max_pad = max(int(v.shape[0]) for _, v in all_rows)
    slab = jnp.stack([jnp.pad(v, (0, max_pad - v.shape[0]), constant_values=f)
                      for f, v in all_rows]).astype(jnp.float32)

    return {"weights": tuple(weights), "slab": slab,
            "num_blocks": num_blocks, "layer_dims": tuple(layer_dims),
            "out_features": out_f, "out_pad": out_pad}


def make_mlp_forward(prepared):
    weights = prepared["weights"]
    slab = prepared["slab"]
    num_blocks = prepared["num_blocks"]
    layer_dims = prepared["layer_dims"]
    out_f = prepared["out_features"]
    out_pad = prepared["out_pad"]

    kernel = _make_fused_mlp_kernel(num_blocks)
    weight_bytes = sum(int(w.size) * 2 for w in weights)
    slab_bytes = int(slab.size) * 4
    vmem = pl.BlockSpec(memory_space=pltpu.MemorySpace.VMEM)

    @jax.jit
    def forward(x):
        n = x.shape[0]
        h = x.reshape(n, -1)                      # x.view(N, -1): free metadata reshape
        k = h.shape[1]
        flops = 2 * n * sum(i * o for i, o in layer_dims)
        bytes_accessed = n * k * 4 + weight_bytes + slab_bytes + n * out_pad * 4
        y_pad = pl.pallas_call(
            kernel,
            out_shape=jax.ShapeDtypeStruct((n, out_pad), jnp.float32),
            in_specs=[vmem] * (2 + len(weights)),
            out_specs=vmem,
            compiler_params=pltpu.CompilerParams(
                vmem_limit_bytes=32 * 1024 * 1024),
            cost_estimate=pl.CostEstimate(
                flops=flops,
                transcendentals=num_blocks * out_pad,
                bytes_accessed=bytes_accessed),
        )(h, *weights, slab)
        return y_pad[:, :out_f]

    return forward


# ----------------------------- Pure-JAX reference -----------------------------

def mlp_forward_ref(x, params):
    """Mirrors PyTorch semantics (including the block Linear biases, which the
    kernel omits because training-mode BN cancels them): bf16 matmuls with f32
    accumulation, f32 BN/ReLU."""
    h = x.reshape(x.shape[0], -1).astype(jnp.float32)
    for p in params:
        if p[0] == "block":
            _, w, b, gamma, beta = p
            y = jnp.dot(h.astype(jnp.bfloat16), w.T.astype(jnp.bfloat16),
                        preferred_element_type=jnp.float32) + b
            mean = jnp.mean(y, axis=0, keepdims=True)
            var = jnp.mean((y - mean) ** 2, axis=0, keepdims=True)
            y = (y - mean) / jnp.sqrt(var + _EPS) * gamma + beta
            h = jnp.maximum(y, 0.0)
        else:
            _, w, b = p
            h = jnp.dot(h.astype(jnp.bfloat16), w.T.astype(jnp.bfloat16),
                        preferred_element_type=jnp.float32) + b
    return h


if __name__ == "__main__":
    key = jax.random.PRNGKey(0)
    # MNIST-like small config: input (C, H, W) = (4, 8, 8) -> 256 features.
    input_shape = (4, 8, 8)
    layer_sizes = [32, 32, 10]
    batch = 8

    k_in, k_param = jax.random.split(key)
    x = jax.random.normal(k_in, (batch,) + input_shape, dtype=jnp.float32)

    params = init_mlp_params(k_param, layer_sizes, input_shape)
    prepared = prepare_params(
        params, input_shape[0] * input_shape[1] * input_shape[2])
    forward = make_mlp_forward(prepared)

    out = forward(x)
    out = jax.block_until_ready(out)

    ref = mlp_forward_ref(x, params)
    assert out.shape == (batch, layer_sizes[-1])
    assert jnp.allclose(out, ref, atol=2e-2, rtol=2e-2), "mismatch vs reference"

    print("KERNEL_OK")
</pallas_src>

<mosaic_0001>
module attributes {stable_mosaic.version = 11 : i64} {
  func.func @kernel(%arg0: memref<8x256xf32, #tpu.memory_space<vmem>>, %arg1: memref<256x128xbf16, #tpu.memory_space<vmem>>, %arg2: memref<128x128xbf16, #tpu.memory_space<vmem>>, %arg3: memref<128x128xbf16, #tpu.memory_space<vmem>>, %arg4: memref<5x128xf32, #tpu.memory_space<vmem>>, %arg5: memref<8x128xf32, #tpu.memory_space<vmem>>) attributes {dimension_semantics = [], scalar_prefetch = 0 : i64, scratch_operands = 0 : i64, tpu.core_type = #tpu.core_type<tc>} {
    %c0 = arith.constant 0 : index
    %c0_0 = arith.constant 0 : index
    %0 = vector.load %arg0[%c0, %c0_0] : memref<8x256xf32, #tpu.memory_space<vmem>>, vector<8x256xf32>
    %1 = arith.truncf %0 : vector<8x256xf32> to vector<8x256xbf16>
    %c0_1 = arith.constant 0 : index
    %c0_2 = arith.constant 0 : index
    %2 = vector.load %arg1[%c0_1, %c0_2] : memref<256x128xbf16, #tpu.memory_space<vmem>>, vector<256x128xbf16>
    %cst = arith.constant dense<0.000000e+00> : vector<8x128xf32>
    %3 = tpu.matmul %1, %2, %cst {dimension_numbers = #tpu.dot_dimension_numbers<[1], [0], [0], [1], [0, 0, 1, 1], [], []>} : vector<8x256xbf16>, vector<256x128xbf16>, vector<8x128xf32> -> vector<8x128xf32>
    %cst_3 = arith.constant dense<0.000000e+00> : vector<128xf32>
    %4 = vector.multi_reduction <add>, %3, %cst_3 [0] : vector<8x128xf32> to vector<128xf32>
    %5 = vector.shape_cast %4 : vector<128xf32> to vector<1x128xf32>
    %cst_4 = arith.constant 1.250000e-01 : f32
    %6 = vector.broadcast %cst_4 : f32 to vector<1x128xf32>
    %7 = arith.mulf %5, %6 : vector<1x128xf32>
    %8 = vector.broadcast %7 : vector<1x128xf32> to vector<8x128xf32>
    %9 = arith.subf %3, %8 : vector<8x128xf32>
    %10 = arith.mulf %9, %9 : vector<8x128xf32>
    %cst_5 = arith.constant dense<0.000000e+00> : vector<128xf32>
    %11 = vector.multi_reduction <add>, %10, %cst_5 [0] : vector<8x128xf32> to vector<128xf32>
    %12 = vector.shape_cast %11 : vector<128xf32> to vector<1x128xf32>
    %cst_6 = arith.constant 1.250000e-01 : f32
    %13 = vector.broadcast %cst_6 : f32 to vector<1x128xf32>
    %14 = arith.mulf %12, %13 : vector<1x128xf32>
    %c0_7 = arith.constant 0 : index
    %c0_8 = arith.constant 0 : index
    %15 = vector.load %arg4[%c0_7, %c0_8] : memref<5x128xf32, #tpu.memory_space<vmem>>, vector<1x128xf32>
    %c1 = arith.constant 1 : index
    %c0_9 = arith.constant 0 : index
    %16 = vector.load %arg4[%c1, %c0_9] : memref<5x128xf32, #tpu.memory_space<vmem>>, vector<1x128xf32>
    %cst_10 = arith.constant 9.99999974E-6 : f32
    %17 = vector.broadcast %cst_10 : f32 to vector<1x128xf32>
    %18 = arith.addf %14, %17 : vector<1x128xf32>
    %19 = math.rsqrt %18 : vector<1x128xf32>
    %20 = vector.broadcast %19 : vector<1x128xf32> to vector<8x128xf32>
    %21 = arith.mulf %9, %20 : vector<8x128xf32>
    %22 = vector.broadcast %15 : vector<1x128xf32> to vector<8x128xf32>
    %23 = arith.mulf %21, %22 : vector<8x128xf32>
    %24 = vector.broadcast %16 : vector<1x128xf32> to vector<8x128xf32>
    %25 = arith.addf %23, %24 : vector<8x128xf32>
    %cst_11 = arith.constant 0.000000e+00 : f32
    %26 = vector.broadcast %cst_11 : f32 to vector<8x128xf32>
    %27 = arith.maximumf %25, %26 : vector<8x128xf32>
    %28 = arith.truncf %27 : vector<8x128xf32> to vector<8x128xbf16>
    %c0_12 = arith.constant 0 : index
    %c0_13 = arith.constant 0 : index
    %29 = vector.load %arg2[%c0_12, %c0_13] : memref<128x128xbf16, #tpu.memory_space<vmem>>, vector<128x128xbf16>
    %cst_14 = arith.constant dense<0.000000e+00> : vector<8x128xf32>
    %30 = tpu.matmul %28, %29, %cst_14 {dimension_numbers = #tpu.dot_dimension_numbers<[1], [0], [0], [1], [0, 0, 1, 1], [], []>} : vector<8x128xbf16>, vector<128x128xbf16>, vector<8x128xf32> -> vector<8x128xf32>
    %cst_15 = arith.constant dense<0.000000e+00> : vector<128xf32>
    %31 = vector.multi_reduction <add>, %30, %cst_15 [0] : vector<8x128xf32> to vector<128xf32>
    %32 = vector.shape_cast %31 : vector<128xf32> to vector<1x128xf32>
    %cst_16 = arith.constant 1.250000e-01 : f32
    %33 = vector.broadcast %cst_16 : f32 to vector<1x128xf32>
    %34 = arith.mulf %32, %33 : vector<1x128xf32>
    %35 = vector.broadcast %34 : vector<1x128xf32> to vector<8x128xf32>
    %36 = arith.subf %30, %35 : vector<8x128xf32>
    %37 = arith.mulf %36, %36 : vector<8x128xf32>
    %cst_17 = arith.constant dense<0.000000e+00> : vector<128xf32>
    %38 = vector.multi_reduction <add>, %37, %cst_17 [0] : vector<8x128xf32> to vector<128xf32>
    %39 = vector.shape_cast %38 : vector<128xf32> to vector<1x128xf32>
    %cst_18 = arith.constant 1.250000e-01 : f32
    %40 = vector.broadcast %cst_18 : f32 to vector<1x128xf32>
    %41 = arith.mulf %39, %40 : vector<1x128xf32>
    %c2 = arith.constant 2 : index
    %c0_19 = arith.constant 0 : index
    %42 = vector.load %arg4[%c2, %c0_19] : memref<5x128xf32, #tpu.memory_space<vmem>>, vector<1x128xf32>
    %c3 = arith.constant 3 : index
    %c0_20 = arith.constant 0 : index
    %43 = vector.load %arg4[%c3, %c0_20] : memref<5x128xf32, #tpu.memory_space<vmem>>, vector<1x128xf32>
    %cst_21 = arith.constant 9.99999974E-6 : f32
    %44 = vector.broadcast %cst_21 : f32 to vector<1x128xf32>
    %45 = arith.addf %41, %44 : vector<1x128xf32>
    %46 = math.rsqrt %45 : vector<1x128xf32>
    %47 = vector.broadcast %46 : vector<1x128xf32> to vector<8x128xf32>
    %48 = arith.mulf %36, %47 : vector<8x128xf32>
    %49 = vector.broadcast %42 : vector<1x128xf32> to vector<8x128xf32>
    %50 = arith.mulf %48, %49 : vector<8x128xf32>
    %51 = vector.broadcast %43 : vector<1x128xf32> to vector<8x128xf32>
    %52 = arith.addf %50, %51 : vector<8x128xf32>
    %cst_22 = arith.constant 0.000000e+00 : f32
    %53 = vector.broadcast %cst_22 : f32 to vector<8x128xf32>
    %54 = arith.maximumf %52, %53 : vector<8x128xf32>
    %55 = arith.truncf %54 : vector<8x128xf32> to vector<8x128xbf16>
    %c4 = arith.constant 4 : index
    %c0_23 = arith.constant 0 : index
    %56 = vector.load %arg4[%c4, %c0_23] : memref<5x128xf32, #tpu.memory_space<vmem>>, vector<1x128xf32>
    %c0_24 = arith.constant 0 : index
    %c0_25 = arith.constant 0 : index
    %57 = vector.load %arg3[%c0_24, %c0_25] : memref<128x128xbf16, #tpu.memory_space<vmem>>, vector<128x128xbf16>
    %cst_26 = arith.constant dense<0.000000e+00> : vector<8x128xf32>
    %58 = tpu.matmul %55, %57, %cst_26 {dimension_numbers = #tpu.dot_dimension_numbers<[1], [0], [0], [1], [0, 0, 1, 1], [], []>} : vector<8x128xbf16>, vector<128x128xbf16>, vector<8x128xf32> -> vector<8x128xf32>
    %59 = vector.broadcast %56 : vector<1x128xf32> to vector<8x128xf32>
    %60 = arith.addf %58, %59 : vector<8x128xf32>
    %c0_27 = arith.constant 0 : index
    %c0_28 = arith.constant 0 : index
    %61 = vector.load %arg5[%c0_27, %c0_28] : memref<8x128xf32, #tpu.memory_space<vmem>>, vector<8x128xf32>
    tpu.vector_store %arg5[%c0_27, %c0_28], %60 {strides = array<i32>} : memref<8x128xf32, #tpu.memory_space<vmem>>, vector<8x128xf32>,
    return
  }
}

</mosaic_0001>

<bundles_post_ra>
// kernel: forward.1
= control target key start
LH: loop header
LB: loop body
LE: loop exit
PB: predicated region body
PF: predicated region fallthrough
CT: control target
= control target key end

     0   :  { %s837_s0 = inlined_call_operand.vmem [shape: f32[8,256], index: 0, kind: input, shape index: {}]   ;;  %s838_s1 = inlined_call_operand.vmem [shape: bf16[256,128], index: 1, kind: input, shape index: {}]   ;;  %s839_s2 = inlined_call_operand.vmem [shape: bf16[128,128], index: 2, kind: input, shape index: {}]   ;;  %s840_s3 = inlined_call_operand.vmem [shape: bf16[128,128], index: 3, kind: input, shape index: {}]   ;;  %s841_s4 = inlined_call_operand.vmem [shape: f32[5,128], index: 4, kind: input, shape index: {}]   ;;  %s842_s5 = inlined_call_operand.hbm [shape: f32[8,128], index: 5, kind: output, shape index: {}]  }
   0x1   :  { %v608_v0 = vld [vmem:[%s838_s1 + $0x78] sm:$0xff]   ;;  %v610_v2 = vld [vmem:[%s838_s1 + $0x70] sm:$0xff]   ;;  %v612_v4 = vld [vmem:[%s838_s1 + $0x68] sm:$0xff]  }
   0x2   :  { %v609_v1 = vld [vmem:[%s838_s1 + $0x38] sm:$0xff]   ;;  %525 = vmatprep.subr.bf16.mxu0 %v608_v0  ;;  %v611_v3 = vld [vmem:[%s838_s1 + $0x30] sm:$0xff]   ;;  %v613_v5 = vld [vmem:[%s838_s1 + $0x28] sm:$0xff]  }
   0x3   :  { %526 = vmatpush3.bf16.msra.mxu0 %v609_v1  ;;  %v614_v6 = vld [vmem:[%s838_s1 + $0x60] sm:$0xff]   ;;  %v616_v8 = vld [vmem:[%s838_s1 + $0x58] sm:$0xff]   ;;  %v618_v10 = vld [vmem:[%s838_s1 + $0x50] sm:$0xff]  }
   0x4   :  { %527 = vmatprep.subr.bf16.mxu0 %v610_v2  ;;  %v615_v7 = vld [vmem:[%s838_s1 + $0x20] sm:$0xff]   ;;  %v617_v9 = vld [vmem:[%s838_s1 + $0x18] sm:$0xff]   ;;  %v23_v11 = vld [vmem:[%s837_s0 + $0x8] sm:$0xff] }
   0x5   :  { %v619_v12 = vld [vmem:[%s838_s1 + $0x10] sm:$0xff]   ;;  %v25_v13 = vpack.c.bf16 %v23_v11, %v23_v11  ;;  %v620_v14 = vld [vmem:[%s838_s1 + $0x48] sm:$0xff]   ;;  %v622_v16 = vld [vmem:[%s838_s1 + $0x40] sm:$0xff]  }
   0x6   :  { %v621_v15 = vld [vmem:[%s838_s1 + $0x8] sm:$0xff]   ;;  %v623_v17 = vld [vmem:[%s838_s1] sm:$0xff]  }
   0x7   :  { %528 = vmatpush3.bf16.msra.mxu0 %v611_v3  ;;  %186 = vmatprep.mubr.bf16.mxu0 %v25_v13  ;;  %v22_v18 = vld [vmem:[%s837_s0] sm:$0xff] }
   0x8   :  { %529 = vmatprep.subr.bf16.mxu0 %v612_v4 }
   0xb   :  { %530 = vmatpush3.bf16.msra.mxu0 %v613_v5 }
   0xc   :  { %531 = vmatprep.subr.bf16.mxu0 %v614_v6 }
   0xf   :  { %532 = vmatpush3.bf16.msra.mxu0 %v615_v7 }
  0x10   :  { %533 = vmatprep.subr.bf16.mxu0 %v616_v8 }
  0x13   :  { %534 = vmatpush3.bf16.msra.mxu0 %v617_v9 }
  0x14   :  { %535 = vmatprep.subr.bf16.mxu0 %v618_v10 }
  0x17   :  { %536 = vmatpush3.bf16.msra.mxu0 %v619_v12 }
  0x18   :  { %537 = vmatprep.subr.bf16.mxu0 %v620_v14 }
  0x1b   :  { %538 = vmatpush3.bf16.msra.mxu0 %v621_v15 }
  0x1c   :  { %10 = vsyncpa [#allocation3], 0  ;;  %539 = vmatprep.subr.bf16.mxu0 %v622_v16  ;;  %v24_v19 = vpack.c.bf16 %v22_v18, %v22_v18  ;;  %v624_v20 = vld [vmem:[%s839_s2 + $0x38] sm:$0xff]   ;;  %v666_v21 = vmov 0.0   ;;  %v625_v22 = vld [vmem:[%s839_s2 + $0x30] sm:$0xff]   ;;  %vm667_vm0 = vmmov 0  }
  0x1d   :  { %565 = vmatprep.subr.bf16.mxu1 %v666_v21  ;;  %v626_v23 = vld [vmem:[%s839_s2 + $0x28] sm:$0xff]   ;;  %v627_v24 = vld [vmem:[%s839_s2 + $0x20] sm:$0xff]   ;;  %v628_v25 = vld [vmem:[%s839_s2 + $0x18] sm:$0xff]   ;;  %581 = vmatprep.mubr.msk.bf16.mxu1 %vm667_vm0, %v666_v21  ;;  %s668_s15 = smov [#allocation2]  }
  0x1e   :  { %566 = vmatpush3.bf16.msra.mxu1 %v624_v20  ;;  %v629_v26 = vld [vmem:[%s839_s2 + $0x10] sm:$0xff]   ;;  %v630_v27 = vld [vmem:[%s839_s2 + $0x8] sm:$0xff]   ;;  %v631_v28 = vld [vmem:[%s839_s2] sm:$0xff]   ;;  %s480_s16 = sshll.u32 %s668_s15, 4  ;;  %s481_s16 = int_to_ptr.vmem [resolvable:$true] %s480_s16 }
  0x1f   :  { %540 = vmatpush3.bf16.msra.mxu0 %v623_v17  ;;  %567 = vmatprep.subr.bf16.mxu1 %v666_v21  ;;  %v504_v52 = vld [vmem:[%s841_s4] ss:$0 sm:$0xff]  ;;  %v505_v54 = vld [vmem:[%s841_s4 + $0x1] ss:$0 sm:$0xff]  ;;  %v632_v59 = vld [vmem:[%s840_s3 + $0x38] sm:$0xff]   ;;  %s644_s17 = scalar_lea.vmem %s481_s16, 128  ;;  %p649_p1 = scmp.lt.s32.totalorder %s481_s16, %s481_s16 }
  0x20   :  { %585 = vmatprep.subr.bf16.mxu0 %v666_v21  ;;  %v633_v60 = vld [vmem:[%s840_s3 + $0x30] sm:$0xff]   ;;  %v634_v61 = vld [vmem:[%s840_s3 + $0x28] sm:$0xff]   ;;  %v635_v62 = vld [vmem:[%s840_s3 + $0x20] sm:$0xff]   ;;  %p645_p0 = scmp.ne.s32.totalorder %s481_s16, %s644_s17  ;;  %p650_p2 = scmp.lt.s32.totalorder %s644_s17, %s644_s17 }
  0x21   :  { %v636_v63 = vld [vmem:[%s840_s3 + $0x18] sm:$0xff]   ;;  %v637_v0 = vld [vmem:[%s840_s3 + $0x10] sm:$0xff]   ;;  %v638_v1 = vld [vmem:[%s840_s3 + $0x8] sm:$0xff]  }
  0x22   :  { %187 = vmatmul.mubr.bf16.vlgmr.msra.gmra.mxu0 %v24_v19  ;;  %568 = vmatpush3.bf16.msra.mxu1 %v625_v22  ;;  %v639_v2 = vld [vmem:[%s840_s3] sm:$0xff]   ;;  %p651_p3 = por %p650_p2, %p649_p1 }
  0x23   :  { %569 = vmatprep.subr.bf16.mxu1 %v666_v21  ;;  %601 = vmatprep.mubr.msk.bf16.mxu0 %vm667_vm0, %v666_v21 }
  0x24   :  { %586 = vmatpush3.bf16.msra.mxu0 %v632_v59  ;;  %p652_p4 = pnand %p651_p3, %p645_p0 }
  0x25   :  { %587 = vmatprep.subr.bf16.mxu0 %v666_v21 }
  0x26   :  { %570 = vmatpush3.bf16.msra.mxu1 %v626_v23 }
  0x27   :  { %571 = vmatprep.subr.bf16.mxu1 %v666_v21 }
  0x28   :  { %588 = vmatpush3.bf16.msra.mxu0 %v633_v60 }
  0x29   :  { %589 = vmatprep.subr.bf16.mxu0 %v666_v21 }
  0x2a   :  { %572 = vmatpush3.bf16.msra.mxu1 %v627_v24 }
  0x2b   :  { %573 = vmatprep.subr.bf16.mxu1 %v666_v21 }
  0x2c   :  { %590 = vmatpush3.bf16.msra.mxu0 %v634_v61 }
  0x2d   :  { %591 = vmatprep.subr.bf16.mxu0 %v666_v21 }
  0x2e   :  { %574 = vmatpush3.bf16.msra.mxu1 %v628_v25  ;;  %v514_v25 = vld [vmem:[%s841_s4 + $0x2] ss:$0 sm:$0xff] }
  0x2f   :  { %575 = vmatprep.subr.bf16.mxu1 %v666_v21 }
  0x30   :  { %592 = vmatpush3.bf16.msra.mxu0 %v635_v62 }
  0x31   :  { %593 = vmatprep.subr.bf16.mxu0 %v666_v21 }
  0x32   :  { %576 = vmatpush3.bf16.msra.mxu1 %v629_v26 }
  0x33   :  { %577 = vmatprep.subr.bf16.mxu1 %v666_v21 }
  0x34   :  { %594 = vmatpush3.bf16.msra.mxu0 %v636_v63 }
  0x35   :  { %595 = vmatprep.subr.bf16.mxu0 %v666_v21 }
  0x36   :  { %578 = vmatpush3.bf16.msra.mxu1 %v630_v27  ;;  %v515_v27 = vld [vmem:[%s841_s4 + $0x3] ss:$0 sm:$0xff] }
  0x37   :  { %579 = vmatprep.subr.bf16.mxu1 %v666_v21 }
  0x38   :  { %596 = vmatpush3.bf16.msra.mxu0 %v637_v0 }
  0x39   :  { %597 = vmatprep.subr.bf16.mxu0 %v666_v21 }
  0x3a   :  { %580 = vmatpush3.bf16.msra.mxu1 %v631_v28 }
  0x3c   :  { %598 = vmatpush3.bf16.msra.mxu0 %v638_v1 }
  0x3d   :  { %599 = vmatprep.subr.bf16.mxu0 %v666_v21 }
  0x40   :  { %600 = vmatpush3.bf16.msra.mxu0 %v639_v2 }
  0xe2   :  { %v541_v29 = vpop.f32.mrf.mxu0 }
  0xe4   :  { %v542_v30 = vpop.f32.mrf.mxu0 }
  0xe5   :  { %v543_v31 = vadd.f32 %v542_v30, %v541_v29 }
  0xe6   :  { %v544_v32 = vpop.f32.mrf.mxu0 }
  0xe7   :  { %v194_v33 = vrot.slane %v543_v31, 4  ;;  %v516_v32 = vld [vmem:[%s841_s4 + $0x4] ss:$0 sm:$0xff] }
  0xe8   :  { %v545_v34 = vpop.f32.mrf.mxu0 }
  0xe9   :  { %v195_v35 = vadd.f32 %v543_v31, %v194_v33 }
  0xeb   :  { %v196_v36 = vrot.slane %v195_v35, 2 }
  0xed   :  { %v197_v37 = vadd.f32 %v196_v36, %v195_v35 }
  0xef   :  { %v198_v38 = vrot.slane %v197_v37, 1 }
  0xf1   :  { %v199_v39 = vadd.f32 %v198_v38, %v197_v37 }
  0xf3   :  { %v200_v40 = vmul.f32 0.125, %v199_v39 }
  0xf5   :  { %v201_v41 = vsub.f32 %v543_v31, %v200_v40 }
  0xf7   :  { %v202_v42 = vmul.f32 %v201_v41, %v201_v41 }
  0xf9   :  { %v203_v43 = vrot.slane %v202_v42, 4 }
  0xfb   :  { %v204_v44 = vadd.f32 %v203_v43, %v202_v42 }
  0xfd   :  { %v205_v45 = vrot.slane %v204_v44, 2 }
  0xff   :  { %v206_v46 = vadd.f32 %v205_v45, %v204_v44 }
 0x101   :  { %v207_v47 = vrot.slane %v206_v46, 1 }
 0x103   :  { %v208_v48 = vadd.f32 %v207_v47, %v206_v46 }
 0x105   :  { %v209_v49 = vmul.f32 0.125, %v208_v48 }
 0x107   :  { %v212_v50 = vadd.f32 1e-05, %v209_v49 }
 0x109   :  { %640 = vrsqrt.f32 %v212_v50 }
 0x116   :  { %v641_v51 = vpop.eup %640 }
 0x117   :  { %v214_v53 = vmul.f32 %v641_v51, %v201_v41 }
 0x119   :  { %v219_v55 = vmul.f32 %v504_v52, %v214_v53 }
 0x11b   :  { %v224_v56 = vadd.f32 %v505_v54, %v219_v55 }
 0x11d   :  { %v225_v57 = vmax.f32 %v224_v56, 0.0 }
 0x11f   :  { %v226_v58 = vpack.c.bf16 %v225_v57, %v225_v57 }
 0x121   :  { %582 = vmatmul.mubr.bf16.vlgmr.msra.gmra.mxu1 %v226_v58 }
 0x1e1   :  { %v325_v3 = vpop.f32.mrf.mxu1 }
 0x1e2   :  { %v331_v4 = vrot.slane %v325_v3, 4 }
 0x1e3   :  { %v583_v5 = vpop.f32.mrf.mxu1 }
 0x1e4   :  { %v332_v6 = vadd.f32 %v331_v4, %v325_v3 }
 0x1e5   :  { %v328_v7 = vpop.f32.mrf.mxu1 }
 0x1e6   :  { %v333_v8 = vrot.slane %v332_v6, 2 }
 0x1e7   :  { %v584_v9 = vpop.f32.mrf.mxu1 }
 0x1e8   :  { %v334_v10 = vadd.f32 %v333_v8, %v332_v6 }
 0x1ea   :  { %v335_v11 = vrot.slane %v334_v10, 1 }
 0x1ec   :  { %v336_v12 = vadd.f32 %v335_v11, %v334_v10 }
 0x1ee   :  { %v337_v13 = vmul.f32 0.125, %v336_v12 }
 0x1f0   :  { %v338_v14 = vsub.f32 %v325_v3, %v337_v13 }
 0x1f2   :  { %v339_v15 = vmul.f32 %v338_v14, %v338_v14 }
 0x1f4   :  { %v340_v16 = vrot.slane %v339_v15, 4 }
 0x1f6   :  { %v341_v17 = vadd.f32 %v340_v16, %v339_v15 }
 0x1f8   :  { %v342_v18 = vrot.slane %v341_v17, 2 }
 0x1fa   :  { %v343_v19 = vadd.f32 %v342_v18, %v341_v17 }
 0x1fc   :  { %v344_v20 = vrot.slane %v343_v19, 1 }
 0x1fe   :  { %v345_v21 = vadd.f32 %v344_v20, %v343_v19 }
 0x200   :  { %v346_v22 = vmul.f32 0.125, %v345_v21 }
 0x202   :  { %v349_v23 = vadd.f32 1e-05, %v346_v22 }
 0x204   :  { %642 = vrsqrt.f32 %v349_v23 }
 0x211   :  { %v643_v24 = vpop.eup %642 }
 0x212   :  { %v351_v26 = vmul.f32 %v643_v24, %v338_v14 }
 0x214   :  { %v356_v28 = vmul.f32 %v514_v25, %v351_v26 }
 0x216   :  { %v361_v29 = vadd.f32 %v515_v27, %v356_v28 }
 0x218   :  { %v362_v30 = vmax.f32 %v361_v29, 0.0 }
 0x21a   :  { %v363_v31 = vpack.c.bf16 %v362_v30, %v362_v30 }
 0x21c   :  { %602 = vmatmul.mubr.bf16.vlgmr.msra.gmra.mxu0 %v363_v31 }
 0x2dc   :  { %v467_v33 = vpop.f32.mrf.mxu0 }
 0x2dd   :  { %v468_v34 = vadd.f32 %v516_v32, %v467_v33 }
 0x2de   :  { %v603_v35 = vpop.f32.mrf.mxu0 }
 0x2df   :  { %473 = vst [vmem:[#allocation2] sm:$0xff] %v468_v34 }
 0x2e0   :  { %v470_v36 = vpop.f32.mrf.mxu0 }
 0x2e1   :  { %655 = shalt.err (!%p652_p4)
}
 0x2e2   :  { %483 = dma.vmem_to_hbm [thread:$0]  %s481_s16, 128, %s842_s5, [#allocation3]   ;;  %v604_v37 = vpop.f32.mrf.mxu0 }
 0x2e3   :  { %664 = dma.done.wait [#allocation3], 128  }
 0x2e4   :  { %665 = vsyncadd [#allocation3], 4294967168 }
 0x2e5   :  { %487 = vsyncpa [#allocation3], 1 }

</bundles_post_ra>
